<compile_context>
chip_gen: v7x
topology: tpu7x:2x2x1
jax: 0.10.0
libtpu: 0.0.40
codegen_flags: <defaults>
</compile_context>

<pallas_src>
import functools

import jax
import jax.numpy as jnp
from jax.experimental import pallas as pl
from jax.experimental.pallas import tpu as pltpu

LN_EPS = 1e-5
_MIB = 1024 * 1024


def _residual_norm_kernel(x_ref, w1_ref, w2_ref, scale_ref, o_ref, *,
                          approximate_gelu: bool):
    # x_ref:     (TM, D)  input rows (also the residual), native dtype
    # w1_ref:    (D,  H)  first MLP weight (no bias), bf16, grid-invariant
    # w2_ref:    (H,  D)  second MLP weight (no bias), bf16, grid-invariant
    # scale_ref: (1,  D)  precomputed (gamma + 1), f32, grid-invariant
    # o_ref:     (TM, D)  output rows
    x = x_ref[...]                                   # residual kept at native precision
    x_mx = x.astype(w1_ref.dtype)                    # bf16 MXU operand

    # ---- model(x): 2-layer bias-free MLP (bf16 MXU operands, f32 accumulate) ----
    h = jnp.dot(x_mx, w1_ref[...], preferred_element_type=jnp.float32)
    h = jax.nn.gelu(h, approximate=approximate_gelu)  # tanh GELU -> EUP (fast path)
    h = h.astype(w2_ref.dtype)                        # bf16 into the second matmul
    out = jnp.dot(h, w2_ref[...], preferred_element_type=jnp.float32)

    # ---- LayerNorm (no affine), eps=1e-5, biased variance (f32 epilogue) ----
    mean = jnp.mean(out, axis=-1, keepdims=True)
    centered = out - mean
    var = jnp.mean(centered * centered, axis=-1, keepdims=True)
    normed = centered * jax.lax.rsqrt(var + LN_EPS)

    # ---- * (gamma + 1) (pre-folded into `scale`) and residual add ----
    y = normed * scale_ref[...] + x.astype(jnp.float32)
    o_ref[...] = y.astype(o_ref.dtype)


def _sublane_pack(itemsize):
    return 8 if itemsize >= 4 else (16 if itemsize == 2 else 32)


def _pick_tm(m_padded, itemsize):
    """Largest sublane-aligned divisor of m_padded that still gives >= 2 grid steps."""
    pack = _sublane_pack(itemsize)
    cap = 2048 if itemsize <= 2 else 1024     # per review: prefer big tiles (>=256 when possible)
    best = pack
    for t in range(pack, min(m_padded // 2, cap) + 1, pack):
        if m_padded % t == 0:
            best = t
    return best


def _vmem_ceiling_bytes():
    cap = 64 * _MIB                            # conservative default (v7x per-TC)
    try:
        cap = int(pltpu.get_tpu_info().vmem_capacity_bytes)
    except Exception:
        pass
    if cap <= 64 * _MIB:
        return 52 * _MIB                       # v7x: leave headroom under the 64 MiB physical
    return 96 * _MIB                           # v5e/v6e: 128 MiB physical VMEM


def residual_norm(x, w1, w2, gamma, *, tm=None, approximate_gelu=True,
                  mxu_dtype=jnp.bfloat16):
    """x: [B, S, D] -> [B, S, D].  w1: [D, H], w2: [H, D], gamma: [D]."""
    B, S, D = x.shape
    H = w1.shape[1]
    M = B * S
    x2 = x.reshape(M, D)

    # bf16 MXU operands (cast once, halves weight DMA bytes + VMEM residency).
    w1_mx = w1.astype(mxu_dtype)
    w2_mx = w2.astype(mxu_dtype)
    # Fold the "+1" of the LayerNorm scale once, outside the grid loop (f32).
    scale = (gamma.astype(jnp.float32) + 1.0).reshape(1, D)

    itemsize = jnp.dtype(x.dtype).itemsize
    pack = _sublane_pack(itemsize)

    # Pad rows so the grid always has >= 2 steps: enables DMA/compute overlap
    # and lets the "parallel" row axis shard across v7x's two TensorCores.
    m_quant = 2 * pack
    M_pad = max(-(-M // m_quant) * m_quant, m_quant)
    if M_pad != M:
        x2 = jnp.pad(x2, ((0, M_pad - M), (0, 0)))

    if tm is None:
        tm = _pick_tm(M_pad, itemsize)
    assert M_pad % tm == 0, f"padded row count {M_pad} not divisible by tile {tm}"
    grid_m = M_pad // tm

    # VMEM budget: pipelined x/out tiles, single-buffered resident weights,
    # the f32 GELU intermediate and f32 epilogue temporaries, plus headroom.
    # TODO(synk): for very large D/H (single-buffered w1+w2 residency beyond
    # ~half of the per-TC VMEM, i.e. ~32 MiB on v7x / ~64 MiB on v5e/v6e), add
    # an H-axis "arbitrary" grid dim with a VMEM accumulator instead of keeping
    # both full weight blocks resident.
    w_bpe = jnp.dtype(mxu_dtype).itemsize
    needed = (2 * tm * D * itemsize            # x tile, double-buffered
              + 2 * tm * D * itemsize          # out tile, double-buffered
              + (D * H + H * D) * w_bpe        # weights, single-buffered
              + 2 * D * 4                      # scale
              + tm * H * 4                     # f32 GELU intermediate h
              + 4 * tm * D * 4)                # f32 epilogue temporaries
    vmem_limit = int(min(max(needed + 8 * _MIB, 32 * _MIB), _vmem_ceiling_bytes()))

    cost = pl.CostEstimate(
        flops=4 * M_pad * D * H + 10 * M_pad * D,          # 2 matmuls + LN epilogue
        transcendentals=M_pad * H + M_pad,                 # GELU tanh + rsqrt
        bytes_accessed=(2 * M_pad * D * itemsize           # x in + y out
                        + (D * H + H * D) * w_bpe          # weights
                        + D * 4),                          # scale
    )

    kernel = functools.partial(_residual_norm_kernel,
                               approximate_gelu=approximate_gelu)

    def _build(single_buffer_invariants):
        def inv_spec(shape):
            if single_buffer_invariants:
                return pl.BlockSpec(shape, lambda i: (0, 0),
                                    pipeline_mode=pl.Buffered(1))
            return pl.BlockSpec(shape, lambda i: (0, 0))

        return pl.pallas_call(
            kernel,
            out_shape=jax.ShapeDtypeStruct((M_pad, D), x.dtype),
            grid_spec=pltpu.PrefetchScalarGridSpec(
                num_scalar_prefetch=0,
                grid=(grid_m,),
                in_specs=[
                    pl.BlockSpec((tm, D), lambda i: (i, 0)),   # x rows (pipelined)
                    inv_spec((D, H)),                          # w1 (resident)
                    inv_spec((H, D)),                          # w2 (resident)
                    inv_spec((1, D)),                          # gamma + 1 (resident)
                ],
                out_specs=pl.BlockSpec((tm, D), lambda i: (i, 0)),
            ),
            compiler_params=pltpu.CompilerParams(
                dimension_semantics=("parallel",),
                vmem_limit_bytes=vmem_limit,
            ),
            cost_estimate=cost,
        )

    try:
        out = _build(True)(x2, w1_mx, w2_mx, scale)
    except Exception:
        # Fallback: identical kernel with default (double) buffering on the
        # grid-invariant blocks, in case this Mosaic build rejects Buffered(1).
        out = _build(False)(x2, w1_mx, w2_mx, scale)

    if M_pad != M:
        out = out[:M]
    return out.reshape(B, S, D)


def residual_norm_ref(x, w1, w2, gamma, *, approximate_gelu=True):
    """Pure-JAX f32 reference mirroring the PyTorch forward."""
    h = jax.nn.gelu(jnp.dot(x, w1), approximate=approximate_gelu)
    out = jnp.dot(h, w2)
    mean = jnp.mean(out, axis=-1, keepdims=True)
    var = jnp.mean((out - mean) ** 2, axis=-1, keepdims=True)
    normed = (out - mean) / jnp.sqrt(var + LN_EPS)
    return normed * (gamma + 1.0) + x


if __name__ == "__main__":
    key = jax.random.PRNGKey(0)
    # batch=2, seq=8, dim=128 (lane-dense output), hidden=256 for the inner MLP.
    B, S, D, H = 2, 8, 128, 256

    kx, k1, k2 = jax.random.split(key, 3)
    x = jax.random.normal(kx, (B, S, D), dtype=jnp.float32)
    # Deterministic synthetic parameter init (bias-free MemoryMLP weights).
    w1 = jax.random.normal(k1, (D, H), dtype=jnp.float32) * (1.0 / jnp.sqrt(D))
    w2 = jax.random.normal(k2, (H, D), dtype=jnp.float32) * (1.0 / jnp.sqrt(H))
    gamma = jnp.zeros((D,), dtype=jnp.float32)  # nn.Parameter(torch.zeros(dim))

    y = residual_norm(x, w1, w2, gamma)
    y = jax.block_until_ready(y)

    # bf16 MXU operands vs f32 reference -> loosened tolerance (per review).
    y_ref = residual_norm_ref(x, w1, w2, gamma)
    assert jnp.allclose(y, y_ref, atol=5e-2, rtol=5e-2), "mismatch vs JAX reference"

    print("KERNEL_OK")
</pallas_src>

<mosaic_0001>
module attributes {stable_mosaic.version = 11 : i64} {
  func.func @_residual_norm_kernel(%arg0: i32, %arg1: memref<8x128xf32, #tpu.memory_space<vmem>>, %arg2: memref<128x256xbf16, #tpu.memory_space<vmem>>, %arg3: memref<256x128xbf16, #tpu.memory_space<vmem>>, %arg4: memref<1x128xf32, #tpu.memory_space<vmem>>, %arg5: memref<8x128xf32, #tpu.memory_space<vmem>>) attributes {dimension_semantics = [#tpu.dimension_semantics<parallel>], iteration_bounds = array<i64: 2>, scalar_prefetch = 0 : i64, scratch_operands = 0 : i64, tpu.core_type = #tpu.core_type<tc>, window_params = [{transform_indices = @transform_0, window_bounds = array<i64: 8, 128>}, {pipeline_mode = #tpu.pipeline_mode<synchronous>, transform_indices = @transform_1, window_bounds = array<i64: 128, 256>}, {pipeline_mode = #tpu.pipeline_mode<synchronous>, transform_indices = @transform_2, window_bounds = array<i64: 256, 128>}, {pipeline_mode = #tpu.pipeline_mode<synchronous>, transform_indices = @transform_3, window_bounds = array<i64: 1, 128>}, {transform_indices = @transform_4, window_bounds = array<i64: 8, 128>}]} {
    %c0 = arith.constant 0 : index
    %c0_0 = arith.constant 0 : index
    %0 = vector.load %arg1[%c0, %c0_0] : memref<8x128xf32, #tpu.memory_space<vmem>>, vector<8x128xf32>
    %1 = arith.truncf %0 : vector<8x128xf32> to vector<8x128xbf16>
    %c0_1 = arith.constant 0 : index
    %c0_2 = arith.constant 0 : index
    %2 = vector.load %arg2[%c0_1, %c0_2] : memref<128x256xbf16, #tpu.memory_space<vmem>>, vector<128x256xbf16>
    %cst = arith.constant dense<0.000000e+00> : vector<8x256xf32>
    %3 = tpu.matmul %1, %2, %cst {dimension_numbers = #tpu.dot_dimension_numbers<[1], [0], [0], [1], [0, 0, 1, 1], [], []>} : vector<8x128xbf16>, vector<128x256xbf16>, vector<8x256xf32> -> vector<8x256xf32>
    %4 = arith.mulf %3, %3 : vector<8x256xf32>
    %5 = arith.mulf %3, %4 : vector<8x256xf32>
    %cst_3 = arith.constant 4.471500e-02 : f32
    %6 = vector.broadcast %cst_3 : f32 to vector<8x256xf32>
    %7 = arith.mulf %6, %5 : vector<8x256xf32>
    %8 = arith.addf %3, %7 : vector<8x256xf32>
    %cst_4 = arith.constant 0.797884583 : f32
    %9 = vector.broadcast %cst_4 : f32 to vector<8x256xf32>
    %10 = arith.mulf %9, %8 : vector<8x256xf32>
    %11 = math.tanh %10 : vector<8x256xf32>
    %cst_5 = arith.constant 1.000000e+00 : f32
    %12 = vector.broadcast %cst_5 : f32 to vector<8x256xf32>
    %13 = arith.addf %12, %11 : vector<8x256xf32>
    %cst_6 = arith.constant 5.000000e-01 : f32
    %14 = vector.broadcast %cst_6 : f32 to vector<8x256xf32>
    %15 = arith.mulf %14, %13 : vector<8x256xf32>
    %16 = arith.mulf %3, %15 : vector<8x256xf32>
    %17 = arith.truncf %16 : vector<8x256xf32> to vector<8x256xbf16>
    %c0_7 = arith.constant 0 : index
    %c0_8 = arith.constant 0 : index
    %18 = vector.load %arg3[%c0_7, %c0_8] : memref<256x128xbf16, #tpu.memory_space<vmem>>, vector<256x128xbf16>
    %cst_9 = arith.constant dense<0.000000e+00> : vector<8x128xf32>
    %19 = tpu.matmul %17, %18, %cst_9 {dimension_numbers = #tpu.dot_dimension_numbers<[1], [0], [0], [1], [0, 0, 1, 1], [], []>} : vector<8x256xbf16>, vector<256x128xbf16>, vector<8x128xf32> -> vector<8x128xf32>
    %cst_10 = arith.constant dense<0.000000e+00> : vector<8xf32>
    %20 = vector.multi_reduction <add>, %19, %cst_10 [1] : vector<8x128xf32> to vector<8xf32>
    %21 = vector.shape_cast %20 : vector<8xf32> to vector<8x1xf32>
    %cst_11 = arith.constant 1.280000e+02 : f32
    %22 = vector.broadcast %cst_11 : f32 to vector<8x1xf32>
    %23 = arith.divf %21, %22 : vector<8x1xf32>
    %24 = vector.broadcast %23 : vector<8x1xf32> to vector<8x128xf32>
    %25 = arith.subf %19, %24 : vector<8x128xf32>
    %26 = arith.mulf %25, %25 : vector<8x128xf32>
    %cst_12 = arith.constant dense<0.000000e+00> : vector<8xf32>
    %27 = vector.multi_reduction <add>, %26, %cst_12 [1] : vector<8x128xf32> to vector<8xf32>
    %28 = vector.shape_cast %27 : vector<8xf32> to vector<8x1xf32>
    %cst_13 = arith.constant 1.280000e+02 : f32
    %29 = vector.broadcast %cst_13 : f32 to vector<8x1xf32>
    %30 = arith.divf %28, %29 : vector<8x1xf32>
    %cst_14 = arith.constant 9.99999974E-6 : f32
    %31 = vector.broadcast %cst_14 : f32 to vector<8x1xf32>
    %32 = arith.addf %30, %31 : vector<8x1xf32>
    %33 = math.rsqrt %32 : vector<8x1xf32>
    %34 = vector.broadcast %33 : vector<8x1xf32> to vector<8x128xf32>
    %35 = arith.mulf %25, %34 : vector<8x128xf32>
    %c0_15 = arith.constant 0 : index
    %c0_16 = arith.constant 0 : index
    %36 = vector.load %arg4[%c0_15, %c0_16] : memref<1x128xf32, #tpu.memory_space<vmem>>, vector<1x128xf32>
    %37 = vector.broadcast %36 : vector<1x128xf32> to vector<8x128xf32>
    %38 = arith.mulf %35, %37 : vector<8x128xf32>
    %39 = arith.addf %38, %0 : vector<8x128xf32>
    %c0_17 = arith.constant 0 : index
    %c0_18 = arith.constant 0 : index
    %40 = vector.load %arg5[%c0_17, %c0_18] : memref<8x128xf32, #tpu.memory_space<vmem>>, vector<8x128xf32>
    tpu.vector_store %arg5[%c0_17, %c0_18], %39 {strides = array<i32>} : memref<8x128xf32, #tpu.memory_space<vmem>>, vector<8x128xf32>,
    return
  }
  func.func @transform_0(%arg0: i32) -> (i32, i32) {
    %c0_i32 = arith.constant 0 : i32
    %c0_i32_0 = arith.constant 0 : i32
    return %arg0, %c0_i32 : i32, i32
  }
  func.func @transform_1(%arg0: i32) -> (i32, i32) {
    %c0_i32 = arith.constant 0 : i32
    %c0_i32_0 = arith.constant 0 : i32
    %c0_i32_1 = arith.constant 0 : i32
    return %c0_i32, %c0_i32_0 : i32, i32
  }
  func.func @transform_2(%arg0: i32) -> (i32, i32) {
    %c0_i32 = arith.constant 0 : i32
    %c0_i32_0 = arith.constant 0 : i32
    %c0_i32_1 = arith.constant 0 : i32
    return %c0_i32, %c0_i32_0 : i32, i32
  }
  func.func @transform_3(%arg0: i32) -> (i32, i32) {
    %c0_i32 = arith.constant 0 : i32
    %c0_i32_0 = arith.constant 0 : i32
    %c0_i32_1 = arith.constant 0 : i32
    return %c0_i32, %c0_i32_0 : i32, i32
  }
  func.func @transform_4(%arg0: i32) -> (i32, i32) {
    %c0_i32 = arith.constant 0 : i32
    %c0_i32_0 = arith.constant 0 : i32
    return %arg0, %c0_i32 : i32, i32
  }
}

module attributes {stable_mosaic.version = 11 : i64} {
  func.func @_residual_norm_kernel(%arg0: i32, %arg1: memref<8x128xf32, #tpu.memory_space<vmem>>, %arg2: memref<128x256xbf16, #tpu.memory_space<vmem>>, %arg3: memref<256x128xbf16, #tpu.memory_space<vmem>>, %arg4: memref<1x128xf32, #tpu.memory_space<vmem>>, %arg5: memref<8x128xf32, #tpu.memory_space<vmem>>) attributes {dimension_semantics = [#tpu.dimension_semantics<parallel>], iteration_bounds = array<i64: 2>, scalar_prefetch = 0 : i64, scratch_operands = 0 : i64, tpu.core_type = #tpu.core_type<tc>, window_params = [{transform_indices = @transform_0, window_bounds = array<i64: 8, 128>}, {pipeline_mode = #tpu.pipeline_mode<synchronous>, transform_indices = @transform_1, window_bounds = array<i64: 128, 256>}, {pipeline_mode = #tpu.pipeline_mode<synchronous>, transform_indices = @transform_2, window_bounds = array<i64: 256, 128>}, {pipeline_mode = #tpu.pipeline_mode<synchronous>, transform_indices = @transform_3, window_bounds = array<i64: 1, 128>}, {transform_indices = @transform_4, window_bounds = array<i64: 8, 128>}]} {
    %c0 = arith.constant 0 : index
    %c0_0 = arith.constant 0 : index
    %0 = vector.load %arg1[%c0, %c0_0] : memref<8x128xf32, #tpu.memory_space<vmem>>, vector<8x128xf32>
    %1 = arith.truncf %0 : vector<8x128xf32> to vector<8x128xbf16>
    %c0_1 = arith.constant 0 : index
    %c0_2 = arith.constant 0 : index
    %2 = vector.load %arg2[%c0_1, %c0_2] : memref<128x256xbf16, #tpu.memory_space<vmem>>, vector<128x256xbf16>
    %cst = arith.constant dense<0.000000e+00> : vector<8x256xf32>
    %3 = tpu.matmul %1, %2, %cst {dimension_numbers = #tpu.dot_dimension_numbers<[1], [0], [0], [1], [0, 0, 1, 1], [], []>} : vector<8x128xbf16>, vector<128x256xbf16>, vector<8x256xf32> -> vector<8x256xf32>
    %4 = arith.mulf %3, %3 : vector<8x256xf32>
    %5 = arith.mulf %3, %4 : vector<8x256xf32>
    %cst_3 = arith.constant 4.471500e-02 : f32
    %6 = vector.broadcast %cst_3 : f32 to vector<8x256xf32>
    %7 = arith.mulf %6, %5 : vector<8x256xf32>
    %8 = arith.addf %3, %7 : vector<8x256xf32>
    %cst_4 = arith.constant 0.797884583 : f32
    %9 = vector.broadcast %cst_4 : f32 to vector<8x256xf32>
    %10 = arith.mulf %9, %8 : vector<8x256xf32>
    %11 = math.tanh %10 : vector<8x256xf32>
    %cst_5 = arith.constant 1.000000e+00 : f32
    %12 = vector.broadcast %cst_5 : f32 to vector<8x256xf32>
    %13 = arith.addf %12, %11 : vector<8x256xf32>
    %cst_6 = arith.constant 5.000000e-01 : f32
    %14 = vector.broadcast %cst_6 : f32 to vector<8x256xf32>
    %15 = arith.mulf %14, %13 : vector<8x256xf32>
    %16 = arith.mulf %3, %15 : vector<8x256xf32>
    %17 = arith.truncf %16 : vector<8x256xf32> to vector<8x256xbf16>
    %c0_7 = arith.constant 0 : index
    %c0_8 = arith.constant 0 : index
    %18 = vector.load %arg3[%c0_7, %c0_8] : memref<256x128xbf16, #tpu.memory_space<vmem>>, vector<256x128xbf16>
    %cst_9 = arith.constant dense<0.000000e+00> : vector<8x128xf32>
    %19 = tpu.matmul %17, %18, %cst_9 {dimension_numbers = #tpu.dot_dimension_numbers<[1], [0], [0], [1], [0, 0, 1, 1], [], []>} : vector<8x256xbf16>, vector<256x128xbf16>, vector<8x128xf32> -> vector<8x128xf32>
    %cst_10 = arith.constant dense<0.000000e+00> : vector<8xf32>
    %20 = vector.multi_reduction <add>, %19, %cst_10 [1] : vector<8x128xf32> to vector<8xf32>
    %21 = vector.shape_cast %20 : vector<8xf32> to vector<8x1xf32>
    %cst_11 = arith.constant 1.280000e+02 : f32
    %22 = vector.broadcast %cst_11 : f32 to vector<8x1xf32>
    %23 = arith.divf %21, %22 : vector<8x1xf32>
    %24 = vector.broadcast %23 : vector<8x1xf32> to vector<8x128xf32>
    %25 = arith.subf %19, %24 : vector<8x128xf32>
    %26 = arith.mulf %25, %25 : vector<8x128xf32>
    %cst_12 = arith.constant dense<0.000000e+00> : vector<8xf32>
    %27 = vector.multi_reduction <add>, %26, %cst_12 [1] : vector<8x128xf32> to vector<8xf32>
    %28 = vector.shape_cast %27 : vector<8xf32> to vector<8x1xf32>
    %cst_13 = arith.constant 1.280000e+02 : f32
    %29 = vector.broadcast %cst_13 : f32 to vector<8x1xf32>
    %30 = arith.divf %28, %29 : vector<8x1xf32>
    %cst_14 = arith.constant 9.99999974E-6 : f32
    %31 = vector.broadcast %cst_14 : f32 to vector<8x1xf32>
    %32 = arith.addf %30, %31 : vector<8x1xf32>
    %33 = math.rsqrt %32 : vector<8x1xf32>
    %34 = vector.broadcast %33 : vector<8x1xf32> to vector<8x128xf32>
    %35 = arith.mulf %25, %34 : vector<8x128xf32>
    %c0_15 = arith.constant 0 : index
    %c0_16 = arith.constant 0 : index
    %36 = vector.load %arg4[%c0_15, %c0_16] : memref<1x128xf32, #tpu.memory_space<vmem>>, vector<1x128xf32>
    %37 = vector.broadcast %36 : vector<1x128xf32> to vector<8x128xf32>
    %38 = arith.mulf %35, %37 : vector<8x128xf32>
    %39 = arith.addf %38, %0 : vector<8x128xf32>
    %c0_17 = arith.constant 0 : index
    %c0_18 = arith.constant 0 : index
    %40 = vector.load %arg5[%c0_17, %c0_18] : memref<8x128xf32, #tpu.memory_space<vmem>>, vector<8x128xf32>
    tpu.vector_store %arg5[%c0_17, %c0_18], %39 {strides = array<i32>} : memref<8x128xf32, #tpu.memory_space<vmem>>, vector<8x128xf32>,
    return
  }
  func.func @transform_0(%arg0: i32) -> (i32, i32) {
    %c0_i32 = arith.constant 0 : i32
    %c0_i32_0 = arith.constant 0 : i32
    return %arg0, %c0_i32 : i32, i32
  }
  func.func @transform_1(%arg0: i32) -> (i32, i32) {
    %c0_i32 = arith.constant 0 : i32
    %c0_i32_0 = arith.constant 0 : i32
    %c0_i32_1 = arith.constant 0 : i32
    return %c0_i32, %c0_i32_0 : i32, i32
  }
  func.func @transform_2(%arg0: i32) -> (i32, i32) {
    %c0_i32 = arith.constant 0 : i32
    %c0_i32_0 = arith.constant 0 : i32
    %c0_i32_1 = arith.constant 0 : i32
    return %c0_i32, %c0_i32_0 : i32, i32
  }
  func.func @transform_3(%arg0: i32) -> (i32, i32) {
    %c0_i32 = arith.constant 0 : i32
    %c0_i32_0 = arith.constant 0 : i32
    %c0_i32_1 = arith.constant 0 : i32
    return %c0_i32, %c0_i32_0 : i32, i32
  }
  func.func @transform_4(%arg0: i32) -> (i32, i32) {
    %c0_i32 = arith.constant 0 : i32
    %c0_i32_0 = arith.constant 0 : i32
    return %arg0, %c0_i32 : i32, i32
  }
}

</mosaic_0001>

<bundles_post_ra>
// kernel: tpu_custom_call.1
= control target key start
LH: loop header
LB: loop body
LE: loop exit
PB: predicated region body
PF: predicated region fallthrough
CT: control target
= control target key end

     0   :  { %9 = vsyncpa [#allocation3], 0  ;;  %s1320_s0 = inlined_call_operand.hbm [shape: f32[16,128], index: 0, kind: input, shape index: {}]   ;;  %s1321_s1 = inlined_call_operand.hbm [shape: bf16[128,256], index: 1, kind: input, shape index: {}]   ;;  %s1322_s2 = inlined_call_operand.hbm [shape: bf16[256,128], index: 2, kind: input, shape index: {}]   ;;  %s1323_s3 = inlined_call_operand.vmem [shape: f32[1,128], index: 3, kind: input, shape index: {}]   ;;  %s1324_s4 = inlined_call_operand.hbm [shape: f32[16,128], index: 4, kind: output, shape index: {}]  }
   0x1   :  { %11 = vsyncpa [#allocation3 + $0x1], 0 }
   0x2   :  { %12 = vsyncpa [#allocation6], 0 }
   0x3   :  { %13 = vsyncpa [#allocation4], 0 }
   0x4   :  { %15 = vsyncpa [#allocation4 + $0x1], 0  ;;  %s1076_s15 = smov 0   ;;  %s1078_s16 = smov 0  }
   0x5   :  { %s1080_s17 = smov 0   ;;  %s1082_s18 = smov 0  }
   0x6 LB: > { %s1097_s19 = sadd.s32 4294967295, %s1040_s18   ;;  %s695_s20 = sadd.s32 4294967294, %s1040_s18   ;;  %s1040_s18 = sphi %s1082_s18, %s1344_s18   ;;  %s1036_s17 = sphi %s1080_s17, %s1343_s17   ;;  %s1032_s16 = sphi %s1078_s16, %s1342_s16   ;;  %s1028_s15 = sphi %s1076_s15, %s1341_s15  }
   0x7   : > { %p41_p0 = scmp.ne.s32.totalorder %s1032_s16, %s1028_s15  ;;  %p1325_p1 = scmp.eq.s32.totalorder %s1097_s19, 0 }
   0x8   : > { %p134_p3 = scmp.eq.s32.totalorder %s695_s20, 1  ;;  %p696_p5 = scmp.ge.s32.totalorder %s1040_s18, 1 }
   0x9   : > { %p1106_p4 = por %p1325_p1, %p41_p0  ;;  %p141_p7 = scmp.lt.s32.totalorder %s1040_s18, 3 }
   0xa   : > { %p1111_p6 = por %p134_p3, %p41_p0  ;;  %s1042_s24 = smov [#allocation5]  }
   0xb   : > { %s1328_s21 = scalar_select %p1106_p4, 1, 0 }
   0xc   : > { %s1329_s22 = scalar_select %p1111_p6, 1, 0 }
   0xd   : > { %p1116_p8 = pnand %p696_p5, %p141_p7  ;;  %s153_s25 = sshll.u32 %s1042_s24, 4  ;;  %s1120_s25 = int_to_ptr.vmem [resolvable:$true] %s153_s25 }
   0xe   : > { %s1043_s27 = smov [#allocation7]   ;;  %s884_s5 = scalar_lea.hbm %s1321_s1, 2048 }
   0xf   : > { %p778_p9 = pneg %p1116_p8  ;;  %s166_s28 = sshll.u32 %s1043_s27, 4  ;;  %s1131_s28 = int_to_ptr.vmem [resolvable:$true] %s166_s28 }
  0x10   : > { %p885_p12 = scmp.ne.s32.totalorder %s1321_s1, %s884_s5  ;;  %p891_p5 = scmp.lt.u32.totalorder %s884_s5, %s1321_s1 }
  0x11   : > { %p1127_p11 = pnand %p778_p9, %p1325_p1 }
  0x13   : > { %p886_p13 = pneg %p1127_p11 }
  0x15   : > { %p887_p0 = pnand %p886_p13, %p885_p12 }
  0x17   : > { %p888_p3 = pneg %p887_p0 }
  0x19   : > { %p893_p7 = pnand %p891_p5, %p888_p3 }
  0x1b   : > { %896 = shalt.err (!%p893_p7)
}
  0x1c   : > { %s897_s10 = scalar_lea.vmem %s1120_s25, 2048  ;;  %p905_p2 = scmp.lt.s32.totalorder %s1120_s25, %s1120_s25 }
  0x1d   : > { %p898_p9 = scmp.ne.s32.totalorder %s1120_s25, %s897_s10  ;;  %p906_p12 = scmp.lt.s32.totalorder %s897_s10, %s897_s10 }
  0x1f   : > { %p900_p10 = pnand %p898_p9, %p886_p13  ;;  %p907_p0 = por %p906_p12, %p905_p2 }
  0x21   : > { %p901_p1 = pneg %p900_p10 }
  0x23   : > { %p908_p6 = pnand %p907_p0, %p901_p1 }
  0x25   : > { %911 = shalt.err (!%p908_p6)
}
  0x26   : > { %s1044_s11 = smov 128   ;;  %s1045_s12 = smov 8  }
  0x27   : > { %781 = dma.hbm_to_vmem [thread:$0]  (!%p1127_p11), %s1321_s1, 2048, %s1120_s25, [#allocation6], %s1044_s11, %s1044_s11, %s1045_s12  }
  0x28   : > { %s912_s27 = scalar_lea.hbm %s1322_s2, 2048 }
  0x29   : > { %p913_p2 = scmp.ne.s32.totalorder %s1322_s2, %s912_s27  ;;  %p919_p10 = scmp.lt.u32.totalorder %s912_s27, %s1322_s2 }
  0x2b   : > { %p915_p1 = pnand %p913_p2, %p886_p13 }
  0x2d   : > { %p916_p6 = pneg %p915_p1 }
  0x2f   : > { %p921_p3 = pnand %p919_p10, %p916_p6 }
  0x31   : > { %924 = shalt.err (!%p921_p3)
}
  0x32   : > { %s925_s25 = scalar_lea.vmem %s1131_s28, 2048  ;;  %p933_p12 = scmp.lt.s32.totalorder %s1131_s28, %s1131_s28 }
  0x33   : > { %p926_p5 = scmp.ne.s32.totalorder %s1131_s28, %s925_s25  ;;  %p934_p0 = scmp.lt.s32.totalorder %s925_s25, %s925_s25 }
  0x35   : > { %p928_p7 = pnand %p926_p5, %p886_p13  ;;  %p935_p2 = por %p934_p0, %p933_p12 }
  0x37   : > { %p929_p9 = pneg %p928_p7 }
  0x39   : > { %p936_p1 = pnand %p935_p2, %p929_p9 }
  0x3b   : > { %939 = shalt.err (!%p936_p1)
}
  0x3c   : > { %s1046_s7 = smov 64   ;;  %s1047_s8 = smov 4  }
  0x3d   : > { %784 = dma.hbm_to_vmem [thread:$0]  (!%p1127_p11), %s1322_s2, 2048, %s1131_s28, [#allocation6], %s1046_s7, %s1046_s7, %s1047_s8  }
  0x3e   : > { %s1186_s11 = sadd.s32 1, %s1040_s18   ;;  %s28_s13 = sadd.s32 1, %s1036_s17 }
  0x3f   : > { %s25_s12 = ssub.s32 %s1040_s18, %s1186_s11  ;;  %p35_p6 = scmp.ne.s32.totalorder %s1036_s17, %s1032_s16 }
  0x40   : > { %p26_p13 = scmp.eq.s32.totalorder %s25_s12, 0  ;;  %p36_p10 = scmp.eq.s32.totalorder %s1040_s18, 0 }
  0x41   : > { %p1332_p5 = scmp.eq.s32.totalorder %s1097_s19, 1  ;;  %p795_p9 = scmp.lt.s32.totalorder %s1040_s18, 2 }
  0x42   : > { %s1195_s14 = scalar_select %p26_p13, %s1036_s17, %s28_s13  }
  0x43   : > { %p37_p3 = por %p36_p10, %p35_p6  ;;  %p1199_p7 = por %p1332_p5, %p35_p6 }
  0x44   : > { %s183_s26 = sand.u32 1, %s1036_s17   ;;  %s701_s28 = sshll.u32 %s1040_s18, 7 }
  0x45   : > { %s1333_s20 = scalar_select %p1199_p7, 1, 0 }
  0x46   : > { %s700_s24 = sshll.u32 %s183_s26, 3  ;;  %s1209_s30 = scalar_lea.hbm %s1320_s0, %s701_s28 }
  0x47   : > { %s187_s5 = scalar_lea.vmem [#allocation2], %s700_s24  ;;  %p1213_p11 = pnand %p795_p9, %p37_p3 }
  0x48   : > { %s194_s6 = sshll.u32 %s187_s5, 4  ;;  %s184_s7 = scalar_lea.sflag [#allocation3], %s183_s26  ;;  %s1211_s6 = int_to_ptr.vmem [resolvable:$true] %s194_s6 }
  0x49   : > { %s940_s8 = scalar_lea.hbm %s1209_s30, 128  ;;  %p942_p0 = pneg %p1213_p11 }
  0x4a   : > { %p941_p12 = scmp.ne.s32.totalorder %s1209_s30, %s940_s8  ;;  %s945_s12 = scalar_lea.hbm %s1320_s0, 256 }
  0x4b   : > { %p946_p13 = scmp.lt.u32.totalorder %s1209_s30, %s1320_s0  ;;  %p947_p6 = scmp.lt.u32.totalorder %s945_s12, %s940_s8 }
  0x4c   : > { %p943_p2 = pnand %p942_p0, %p941_p12  ;;  %p949_p3 = scmp.lt.u32.totalorder %s940_s8, %s1209_s30 }
  0x4d   : > { %p948_p10 = por %p947_p6, %p946_p13 }
  0x4e   : > { %p944_p1 = pneg %p943_p2 }
  0x4f   : > { %p950_p5 = por %p949_p3, %p948_p10 }
  0x51   : > { %p951_p9 = pnand %p950_p5, %p944_p1 }
  0x53   : > { %954 = shalt.err (!%p951_p9)
}
  0x54   : > { %s955_s26 = scalar_lea.vmem %s1211_s6, 128  ;;  %s1048_s28 = smov [#allocation2]  }
  0x55   : > { %p956_p12 = scmp.ne.s32.totalorder %s1211_s6, %s955_s26  ;;  %s960_s27 = sshll.u32 %s1048_s28, 4  ;;  %s961_s27 = int_to_ptr.vmem [resolvable:$false] %s960_s27 }
  0x56   : > { %s962_s29 = scalar_lea.vmem %s961_s27, 256  ;;  %p963_p4 = scmp.lt.s32.totalorder %s1211_s6, %s961_s27 }
  0x57   : > { %p958_p2 = pnand %p956_p12, %p942_p0  ;;  %p964_p13 = scmp.lt.s32.totalorder %s962_s29, %s955_s26 }
  0x59   : > { %p959_p7 = pneg %p958_p2  ;;  %p965_p6 = por %p964_p13, %p963_p4 }
  0x5b   : > { %p966_p10 = pnand %p965_p6, %p959_p7 }
  0x5d   : > { %969 = shalt.err (!%p966_p10)
}
  0x5e   : > { %788 = dma.hbm_to_vmem [thread:$0]  (!%p1213_p11), %s1209_s30, 128, %s1211_s6, %s184_s7  }
  0x5f   : > { %203 = sbr.rel (%p1116_p8) target bundleno = 922 (0x39a), region = 36  ;;  %s1245_s5 = sand.u32 (!%p1116_p8), 1, %s1032_s16  }
  0x60   : > { %s703_s8 = sshll.u32 (!%p1116_p8), %s1245_s5, 3  ;;  %s206_s9 = scalar_lea.sflag (!%p1116_p8), [#allocation3], %s1245_s5 }
  0x61   : > { %s1251_s10 = scalar_lea.vmem (!%p1116_p8), [#allocation2], %s703_s8  ;;  %p1335_p4 = scmp.ne.s32.totalorder (!%p1116_p8), %s1328_s21, 0 }
  0x66   : > { %1015 = dma.done.wait (%p1335_p4), %s206_s9, 128  }
  0x67   : > { %1017 = vsyncadd (%p1335_p4), %s206_s9, 4294967168  ;;  %p1336_p7 = scmp.eq.s32.totalorder %s1097_s19, 0 }
  0x69   : > { %1019 = dma.done.wait (%p1336_p7), [#allocation6], 4096   ;;  %p1337_p8 = pmov %p1336_p7 }
  0x6a   : > { %v1049_v0 = vmov 0   ;;  %v838_v1 = vld [vmem:[#allocation5 + $0x4] ss:$8 sps:$4 sm:$0xff]   ;;  %v840_v2 = vld [vmem:[#allocation5] ss:$8 sps:$4 sm:$0xff]   ;;  %v1262_v17 = vld [vmem:[%s1251_s10] sm:$0xff] }
  0x6b   : > { %1021 = vsyncadd (%p1337_p8), [#allocation6], 4294963200  ;;  %373 = vmatprep.mubr.bf16.mxu0 %v1049_v0  ;;  %341 = vmatprep.subr.bf16.mxu0 %v838_v1  ;;  %v841_v3 = vld [vmem:[#allocation5 + $0x14] ss:$8 sps:$4 sm:$0xff]   ;;  %v843_v4 = vld [vmem:[#allocation5 + $0x10] ss:$8 sps:$4 sm:$0xff]   ;;  %v244_v18 = vpack.c.bf16 %v1262_v17, %v1262_v17 }
  0x6c   : > { %342 = vmatpush1.bf16.msra.mxu0 %v840_v2  ;;  %v844_v5 = vld [vmem:[#allocation5 + $0x24] ss:$8 sps:$4 sm:$0xff]   ;;  %v846_v6 = vld [vmem:[#allocation5 + $0x20] ss:$8 sps:$4 sm:$0xff]   ;;  %v847_v7 = vld [vmem:[#allocation5 + $0x34] ss:$8 sps:$4 sm:$0xff]  }
  0x6d   : > { %343 = vmatprep.subr.bf16.mxu0 %v841_v3  ;;  %v849_v8 = vld [vmem:[#allocation5 + $0x30] ss:$8 sps:$4 sm:$0xff]   ;;  %v850_v9 = vld [vmem:[#allocation5 + $0x44] ss:$8 sps:$4 sm:$0xff]   ;;  %v852_v10 = vld [vmem:[#allocation5 + $0x40] ss:$8 sps:$4 sm:$0xff]  }
  0x6e   : > { %v853_v11 = vld [vmem:[#allocation5 + $0x54] ss:$8 sps:$4 sm:$0xff]   ;;  %v855_v12 = vld [vmem:[#allocation5 + $0x50] ss:$8 sps:$4 sm:$0xff]   ;;  %v856_v13 = vld [vmem:[#allocation5 + $0x64] ss:$8 sps:$4 sm:$0xff]  }
  0x6f   : > { %v858_v14 = vld [vmem:[#allocation5 + $0x60] ss:$8 sps:$4 sm:$0xff]   ;;  %v859_v15 = vld [vmem:[#allocation5 + $0x74] ss:$8 sps:$4 sm:$0xff]   ;;  %v861_v16 = vld [vmem:[#allocation5 + $0x70] ss:$8 sps:$4 sm:$0xff]  }
  0x70   : > { %344 = vmatpush1.bf16.msra.mxu0 %v843_v4  ;;  %v862_v19 = vld [vmem:[#allocation7 + $0x40] sm:$0xff]   ;;  %v864_v21 = vld [vmem:[#allocation7 + $0x48] sm:$0xff]   ;;  %v866_v23 = vld [vmem:[#allocation7 + $0x50] sm:$0xff]   ;;  %s741_s30 = sshll.u32 %s1097_s19, 7  ;;  %s241_s6 = scalar_lea.vmem [#allocation8], %s703_s8 }
  0x71   : > { %345 = vmatprep.subr.bf16.mxu0 %v844_v5  ;;  %v863_v20 = vld [vmem:[#allocation7] sm:$0xff]   ;;  %744 = vmatprep.subr.bf16.mxu1 %v862_v19  ;;  %v865_v22 = vld [vmem:[#allocation7 + $0x8] sm:$0xff]   ;;  %v867_v24 = vld [vmem:[#allocation7 + $0x10] sm:$0xff]   ;;  %s606_s25 = sshll.u32 %s241_s6, 4  ;;  %s1276_s13 = scalar_lea.hbm %s1324_s4, %s741_s30  ;;  %s1278_s25 = int_to_ptr.vmem [resolvable:$true] %s606_s25 }
  0x72   : > { %745 = vmatpush3.bf16.msra.mxu1 %v863_v20  ;;  %v868_v25 = vld [vmem:[#allocation7 + $0x58] sm:$0xff]   ;;  %v870_v27 = vld [vmem:[#allocation7 + $0x60] sm:$0xff]   ;;  %v872_v29 = vld [vmem:[#allocation7 + $0x68] sm:$0xff]   ;;  %s593_s24 = scalar_lea.sflag [#allocation4], %s1245_s5  ;;  %s970_s26 = scalar_lea.vmem %s1278_s25, 128 }
  0x73   : > { %746 = vmatprep.subr.bf16.mxu1 %v864_v21  ;;  %v869_v26 = vld [vmem:[#allocation7 + $0x18] sm:$0xff]   ;;  %v871_v28 = vld [vmem:[#allocation7 + $0x20] sm:$0xff]   ;;  %v873_v30 = vld [vmem:[#allocation7 + $0x28] sm:$0xff]   ;;  %p971_p11 = scmp.ne.s32.totalorder %s1278_s25, %s970_s26  ;;  %p1338_p0 = scmp.ne.s32.totalorder %s1333_s20, 0 }
  0x74   : > { %346 = vmatpush1.bf16.msra.mxu0 %v846_v6  ;;  %v874_v31 = vld [vmem:[#allocation7 + $0x70] sm:$0xff]   ;;  %v876_v33 = vld [vmem:[#allocation7 + $0x78] sm:$0xff]   ;;  %s1050_s19 = smov [#allocation8]  }
  0x75   : > { %347 = vmatprep.subr.bf16.mxu0 %v847_v7  ;;  %v875_v32 = vld [vmem:[#allocation7 + $0x30] sm:$0xff]   ;;  %v877_v34 = vld [vmem:[#allocation7 + $0x38] sm:$0xff]   ;;  %p972_p1 = pnand %p971_p11, %p1338_p0  ;;  %s974_s28 = sshll.u32 %s1050_s19, 4  ;;  %s975_s28 = int_to_ptr.vmem [resolvable:$false] %s974_s28 }
  0x76   : > { %747 = vmatpush3.bf16.msra.mxu1 %v865_v22  ;;  %s976_s27 = scalar_lea.vmem %s975_s28, 256  ;;  %p977_p5 = scmp.lt.s32.totalorder %s1278_s25, %s975_s28 }
  0x77   : > { %748 = vmatprep.subr.bf16.mxu1 %v866_v23  ;;  %p973_p3 = pneg %p972_p1  ;;  %p978_p9 = scmp.lt.s32.totalorder %s976_s27, %s970_s26 }
  0x78   : > { %348 = vmatpush1.bf16.msra.mxu0 %v849_v8  ;;  %v739_v8 = vld [vmem:[%s1323_s3] ss:$0 sm:$0xff] }
  0x79   : > { %349 = vmatprep.subr.bf16.mxu0 %v850_v9  ;;  %p979_p12 = por %p978_p9, %p977_p5 }
  0x7a   : > { %749 = vmatpush3.bf16.msra.mxu1 %v867_v24 }
  0x7b   : > { %750 = vmatprep.subr.bf16.mxu1 %v868_v25  ;;  %p980_p2 = pnand %p979_p12, %p973_p3 }
  0x7c   : > { %350 = vmatpush1.bf16.msra.mxu0 %v852_v10 }
  0x7d   : > { %351 = vmatprep.subr.bf16.mxu0 %v853_v11 }
  0x7e   : > { %751 = vmatpush3.bf16.msra.mxu1 %v869_v26 }
  0x7f   : > { %752 = vmatprep.subr.bf16.mxu1 %v870_v27 }
  0x80   : > { %352 = vmatpush1.bf16.msra.mxu0 %v855_v12 }
  0x81   : > { %353 = vmatprep.subr.bf16.mxu0 %v856_v13 }
  0x82   : > { %753 = vmatpush3.bf16.msra.mxu1 %v871_v28 }
  0x83   : > { %754 = vmatprep.subr.bf16.mxu1 %v872_v29 }
  0x84   : > { %354 = vmatpush1.bf16.msra.mxu0 %v858_v14 }
  0x85   : > { %355 = vmatprep.subr.bf16.mxu0 %v859_v15 }
  0x86   : > { %755 = vmatpush3.bf16.msra.mxu1 %v873_v30 }
  0x87   : > { %756 = vmatprep.subr.bf16.mxu1 %v874_v31 }
  0x88   : > { %356 = vmatpush1.bf16.msra.mxu0 %v861_v16 }
  0x8a   : > { %757 = vmatpush3.bf16.msra.mxu1 %v875_v32 }
  0x8b   : > { %374 = vmatmul.mubr.bf16.vlgmr.msra.gmra.mrb[0].mxu0 %v244_v18  ;;  %758 = vmatprep.subr.bf16.mxu1 %v876_v33 }
  0x8e   : > { %759 = vmatpush3.bf16.msra.mxu1 %v877_v34 }
 0x15e   : > { %v375_v35 = vpop.f32.mrb[0].mxu0 }
 0x15f   : > { %v382_v36 = vmul.f32 %v375_v35, %v375_v35  ;;  %v377_v37 = vpop.f32.mrb[1].mxu0 }
 0x160   : > { %v383_v38 = vmul.f32 %v377_v37, %v377_v37  ;;  %v379_v39 = vpop.f32.mrb[2].mxu0 }
 0x161   : > { %v384_v40 = vmul.f32 %v382_v36, %v375_v35  ;;  %v380_v41 = vpop.f32.mrb[3].mxu0 }
 0x162   : > { %v385_v42 = vmul.f32 %v383_v38, %v377_v37 }
 0x163   : > { %v386_v43 = vmul.f32 0.044715, %v384_v40 }
 0x164   : > { %v387_v44 = vmul.f32 0.044715, %v385_v42 }
 0x165   : > { %v388_v45 = vadd.f32 %v386_v43, %v375_v35 }
 0x166   : > { %v389_v46 = vadd.f32 %v387_v44, %v377_v37 }
 0x167   : > { %v390_v47 = vmul.f32 0.7978846, %v388_v45 }
 0x168   : > { %v391_v48 = vmul.f32 0.7978846, %v389_v46 }
 0x169   : > { %878 = vtanh.f32 %v390_v47 }
 0x16a   : > { %880 = vtanh.f32 %v391_v48 }
 0x173   : > { %v879_v49 = vpop.eup %878 }
 0x174   : > { %v881_v50 = vpop.eup %880  ;;  %v394_v51 = vadd.f32 1.0, %v879_v49 }
 0x175   : > { %v395_v52 = vadd.f32 1.0, %v881_v50 }
 0x176   : > { %v396_v53 = vmul.f32 0.5, %v394_v51 }
 0x177   : > { %v397_v54 = vmul.f32 0.5, %v395_v52 }
 0x178   : > { %v398_v55 = vmul.f32 %v396_v53, %v375_v35 }
 0x179   : > { %v399_v56 = vmul.f32 %v397_v54, %v377_v37 }
 0x17a   : > { %v400_v58 = vpack.c.bf16 %v398_v55, %v398_v55 }
 0x17b   : > { %v401_v57 = vpack.c.bf16 %v399_v56, %v399_v56 }
 0x17d   : > { %562 = vmatprep.mubr.bf16.mxu1 %v401_v57 }
 0x17e   : > { %563 = vmatmul.mubr.bf16.vlgmr.msra.gmra.mrb[0].mxu1 %v400_v58 }
 0x251   : > { %v760_v59 = vpop.f32.mrb[0].mxu1 }
 0x252   : > { %v761_v60 = vpop.f32.mrb[1].mxu1 }
 0x253   : > { %v762_v61 = vadd.f32 %v761_v60, %v760_v59  ;;  %v763_v62 = vpop.f32.mrb[2].mxu1 }
 0x254   : > { %v764_v63 = vpop.f32.mrb[3].mxu1 }
 0x255   : > { %570 = vadd.xlane.f32.xlu0 %v762_v61 }
 0x2e2   : > { %v571_v0 = vpop.xlane.xlu0 %570 }
 0x2e3   : > { %v573_v1 = vmul.f32 0.0078125, %v571_v0 }
 0x2e5   : > { %v574_v2 = vsub.f32 %v762_v61, %v573_v1 }
 0x2e7   : > { %v575_v3 = vmul.f32 %v574_v2, %v574_v2 }
 0x2e9   : > { %576 = vadd.xlane.f32.xlu0 %v575_v3 }
 0x376   : > { %v577_v4 = vpop.xlane.xlu0 %576 }
 0x377   : > { %v578_v5 = vmul.f32 0.0078125, %v577_v4 }
 0x379   : > { %v579_v6 = vadd.f32 1e-05, %v578_v5 }
 0x37b   : > { %882 = vrsqrt.f32 %v579_v6 }
 0x385   : > { %v883_v7 = vpop.eup %882 }
 0x386   : > { %v581_v9 = vmul.f32 %v883_v7, %v574_v2 }
 0x388   : > { %v589_v10 = vmul.f32 %v739_v8, %v581_v9 }
 0x38a   : > { %v590_v11 = vadd.f32 %v589_v10, %v1262_v17 }
 0x38c   : > { %591 = vst [vmem:[%s241_s6] sm:$0xff] %v590_v11 }
 0x38d   : > { %983 = shalt.err (!%p980_p2)
}
 0x38e   : > { %s984_s29 = scalar_lea.hbm %s1276_s13, 128  ;;  %s988_s9 = scalar_lea.hbm %s1324_s4, 256 }
 0x38f   : > { %p985_p13 = scmp.ne.s32.totalorder %s1276_s13, %s984_s29  ;;  %p989_p4 = scmp.lt.u32.totalorder %s1276_s13, %s1324_s4 }
 0x390   : > { %p990_p7 = scmp.lt.u32.totalorder %s988_s9, %s984_s29  ;;  %p992_p11 = scmp.lt.u32.totalorder %s984_s29, %s1276_s13 }
 0x391   : > { %p986_p6 = pnand %p985_p13, %p1338_p0 }
 0x392   : > { %p991_p8 = por %p990_p7, %p989_p4 }
 0x393   : > { %p987_p10 = pneg %p986_p6 }
 0x394   : > { %p993_p1 = por %p992_p11, %p991_p8 }
 0x396   : > { %p994_p3 = pnand %p993_p1, %p987_p10 }
 0x398   : > { %997 = shalt.err (!%p994_p3)
}
 0x399   : > { %776 = dma.vmem_to_hbm [thread:$0]  (%p1338_p0), %s1278_s25, 128, %s1276_s13, %s593_s24  }
 0x39a PF: > { %s618_s23 = sand.u32 1, %s1028_s15   ;;  %p1339_p5 = scmp.ne.s32.totalorder %s1329_s22, 0 }
 0x39b   : > { %p1340_p9 = scmp.ge.s32.totalorder %s1040_s18, 2  ;;  %s619_s30 = scalar_lea.sflag [#allocation4], %s618_s23 }
 0x39d   : > { %p790_p12 = pnand %p1340_p9, %p1339_p5 }
 0x39f   : > { %1023 = dma.done.wait (!%p790_p12), %s619_s30, 128  }
 0x3a0   : > { %1025 = vsyncadd (!%p790_p12), %s619_s30, 4294967168  ;;  %p18_p2 = scmp.ge.s32.totalorder %s1186_s11, 4   ;;  %s1341_s15 = smov %s1032_s16 }
 0x3a1   : > { %s1342_s16 = smov %s1036_s17  ;;  %s1343_s17 = smov %s1195_s14 }
 0x3a2   : > { %s1344_s18 = smov %s1186_s11  ;;  %20 = sbr.rel (!%p18_p2) target bundleno = 6 (0x6), region = 89 }
 0x3a9   :  { %624 = vsyncpa [#allocation3], 1 }
 0x3aa   :  { %626 = vsyncpa [#allocation3 + $0x1], 1 }
 0x3ab   :  { %627 = vsyncpa [#allocation6], 1 }
 0x3ac   :  { %628 = vsyncpa [#allocation4], 1 }
 0x3ad   :  { %630 = vsyncpa [#allocation4 + $0x1], 1 }

// kernel: tpu_custom_call.1
= control target key start
LH: loop header
LB: loop body
LE: loop exit
PB: predicated region body
PF: predicated region fallthrough
CT: control target
= control target key end

     0   :  { %9 = vsyncpa [#allocation3], 0  ;;  %s1320_s0 = inlined_call_operand.hbm [shape: f32[16,128], index: 0, kind: input, shape index: {}]   ;;  %s1321_s1 = inlined_call_operand.hbm [shape: bf16[128,256], index: 1, kind: input, shape index: {}]   ;;  %s1322_s2 = inlined_call_operand.hbm [shape: bf16[256,128], index: 2, kind: input, shape index: {}]   ;;  %s1323_s3 = inlined_call_operand.vmem [shape: f32[1,128], index: 3, kind: input, shape index: {}]   ;;  %s1324_s4 = inlined_call_operand.hbm [shape: f32[16,128], index: 4, kind: output, shape index: {}]  }
   0x1   :  { %11 = vsyncpa [#allocation3 + $0x1], 0 }
   0x2   :  { %12 = vsyncpa [#allocation6], 0 }
   0x3   :  { %13 = vsyncpa [#allocation4], 0 }
   0x4   :  { %15 = vsyncpa [#allocation4 + $0x1], 0  ;;  %s1076_s15 = smov 0   ;;  %s1078_s16 = smov 0  }
   0x5   :  { %s1080_s17 = smov 0   ;;  %s1082_s18 = smov 0  }
   0x6 LB: > { %s1097_s19 = sadd.s32 4294967295, %s1040_s18   ;;  %s695_s20 = sadd.s32 4294967294, %s1040_s18   ;;  %s1040_s18 = sphi %s1082_s18, %s1344_s18   ;;  %s1036_s17 = sphi %s1080_s17, %s1343_s17   ;;  %s1032_s16 = sphi %s1078_s16, %s1342_s16   ;;  %s1028_s15 = sphi %s1076_s15, %s1341_s15  }
   0x7   : > { %p41_p0 = scmp.ne.s32.totalorder %s1032_s16, %s1028_s15  ;;  %p1325_p1 = scmp.eq.s32.totalorder %s1097_s19, 0 }
   0x8   : > { %p134_p3 = scmp.eq.s32.totalorder %s695_s20, 1  ;;  %p696_p5 = scmp.ge.s32.totalorder %s1040_s18, 1 }
   0x9   : > { %p1106_p4 = por %p1325_p1, %p41_p0  ;;  %p141_p7 = scmp.lt.s32.totalorder %s1040_s18, 3 }
   0xa   : > { %p1111_p6 = por %p134_p3, %p41_p0  ;;  %s1042_s24 = smov [#allocation5]  }
   0xb   : > { %s1328_s21 = scalar_select %p1106_p4, 1, 0 }
   0xc   : > { %s1329_s22 = scalar_select %p1111_p6, 1, 0 }
   0xd   : > { %p1116_p8 = pnand %p696_p5, %p141_p7  ;;  %s153_s25 = sshll.u32 %s1042_s24, 4  ;;  %s1120_s25 = int_to_ptr.vmem [resolvable:$true] %s153_s25 }
   0xe   : > { %s1043_s27 = smov [#allocation7]   ;;  %s884_s5 = scalar_lea.hbm %s1321_s1, 2048 }
   0xf   : > { %p778_p9 = pneg %p1116_p8  ;;  %s166_s28 = sshll.u32 %s1043_s27, 4  ;;  %s1131_s28 = int_to_ptr.vmem [resolvable:$true] %s166_s28 }
  0x10   : > { %p885_p12 = scmp.ne.s32.totalorder %s1321_s1, %s884_s5  ;;  %p891_p5 = scmp.lt.u32.totalorder %s884_s5, %s1321_s1 }
  0x11   : > { %p1127_p11 = pnand %p778_p9, %p1325_p1 }
  0x13   : > { %p886_p13 = pneg %p1127_p11 }
  0x15   : > { %p887_p0 = pnand %p886_p13, %p885_p12 }
  0x17   : > { %p888_p3 = pneg %p887_p0 }
  0x19   : > { %p893_p7 = pnand %p891_p5, %p888_p3 }
  0x1b   : > { %896 = shalt.err (!%p893_p7)
}
  0x1c   : > { %s897_s10 = scalar_lea.vmem %s1120_s25, 2048  ;;  %p905_p2 = scmp.lt.s32.totalorder %s1120_s25, %s1120_s25 }
  0x1d   : > { %p898_p9 = scmp.ne.s32.totalorder %s1120_s25, %s897_s10  ;;  %p906_p12 = scmp.lt.s32.totalorder %s897_s10, %s897_s10 }
  0x1f   : > { %p900_p10 = pnand %p898_p9, %p886_p13  ;;  %p907_p0 = por %p906_p12, %p905_p2 }
  0x21   : > { %p901_p1 = pneg %p900_p10 }
  0x23   : > { %p908_p6 = pnand %p907_p0, %p901_p1 }
  0x25   : > { %911 = shalt.err (!%p908_p6)
}
  0x26   : > { %s1044_s11 = smov 128   ;;  %s1045_s12 = smov 8  }
  0x27   : > { %781 = dma.hbm_to_vmem [thread:$0]  (!%p1127_p11), %s1321_s1, 2048, %s1120_s25, [#allocation6], %s1044_s11, %s1044_s11, %s1045_s12  }
  0x28   : > { %s912_s27 = scalar_lea.hbm %s1322_s2, 2048 }
  0x29   : > { %p913_p2 = scmp.ne.s32.totalorder %s1322_s2, %s912_s27  ;;  %p919_p10 = scmp.lt.u32.totalorder %s912_s27, %s1322_s2 }
  0x2b   : > { %p915_p1 = pnand %p913_p2, %p886_p13 }
  0x2d   : > { %p916_p6 = pneg %p915_p1 }
  0x2f   : > { %p921_p3 = pnand %p919_p10, %p916_p6 }
  0x31   : > { %924 = shalt.err (!%p921_p3)
}
  0x32   : > { %s925_s25 = scalar_lea.vmem %s1131_s28, 2048  ;;  %p933_p12 = scmp.lt.s32.totalorder %s1131_s28, %s1131_s28 }
  0x33   : > { %p926_p5 = scmp.ne.s32.totalorder %s1131_s28, %s925_s25  ;;  %p934_p0 = scmp.lt.s32.totalorder %s925_s25, %s925_s25 }
  0x35   : > { %p928_p7 = pnand %p926_p5, %p886_p13  ;;  %p935_p2 = por %p934_p0, %p933_p12 }
  0x37   : > { %p929_p9 = pneg %p928_p7 }
  0x39   : > { %p936_p1 = pnand %p935_p2, %p929_p9 }
  0x3b   : > { %939 = shalt.err (!%p936_p1)
}
  0x3c   : > { %s1046_s7 = smov 64   ;;  %s1047_s8 = smov 4  }
  0x3d   : > { %784 = dma.hbm_to_vmem [thread:$0]  (!%p1127_p11), %s1322_s2, 2048, %s1131_s28, [#allocation6], %s1046_s7, %s1046_s7, %s1047_s8  }
  0x3e   : > { %s1186_s11 = sadd.s32 1, %s1040_s18   ;;  %s28_s13 = sadd.s32 1, %s1036_s17 }
  0x3f   : > { %s25_s12 = ssub.s32 %s1040_s18, %s1186_s11  ;;  %p35_p6 = scmp.ne.s32.totalorder %s1036_s17, %s1032_s16 }
  0x40   : > { %p26_p13 = scmp.eq.s32.totalorder %s25_s12, 0  ;;  %p36_p10 = scmp.eq.s32.totalorder %s1040_s18, 0 }
  0x41   : > { %p1332_p5 = scmp.eq.s32.totalorder %s1097_s19, 1  ;;  %p795_p9 = scmp.lt.s32.totalorder %s1040_s18, 2 }
  0x42   : > { %s1195_s14 = scalar_select %p26_p13, %s1036_s17, %s28_s13  }
  0x43   : > { %p37_p3 = por %p36_p10, %p35_p6  ;;  %p1199_p7 = por %p1332_p5, %p35_p6 }
  0x44   : > { %s183_s26 = sand.u32 1, %s1036_s17   ;;  %s701_s28 = sshll.u32 %s1040_s18, 7 }
  0x45   : > { %s1333_s20 = scalar_select %p1199_p7, 1, 0 }
  0x46   : > { %s700_s24 = sshll.u32 %s183_s26, 3  ;;  %s1209_s30 = scalar_lea.hbm %s1320_s0, %s701_s28 }
  0x47   : > { %s187_s5 = scalar_lea.vmem [#allocation2], %s700_s24  ;;  %p1213_p11 = pnand %p795_p9, %p37_p3 }
  0x48   : > { %s194_s6 = sshll.u32 %s187_s5, 4  ;;  %s184_s7 = scalar_lea.sflag [#allocation3], %s183_s26  ;;  %s1211_s6 = int_to_ptr.vmem [resolvable:$true] %s194_s6 }
  0x49   : > { %s940_s8 = scalar_lea.hbm %s1209_s30, 128  ;;  %p942_p0 = pneg %p1213_p11 }
  0x4a   : > { %p941_p12 = scmp.ne.s32.totalorder %s1209_s30, %s940_s8  ;;  %s945_s12 = scalar_lea.hbm %s1320_s0, 256 }
  0x4b   : > { %p946_p13 = scmp.lt.u32.totalorder %s1209_s30, %s1320_s0  ;;  %p947_p6 = scmp.lt.u32.totalorder %s945_s12, %s940_s8 }
  0x4c   : > { %p943_p2 = pnand %p942_p0, %p941_p12  ;;  %p949_p3 = scmp.lt.u32.totalorder %s940_s8, %s1209_s30 }
  0x4d   : > { %p948_p10 = por %p947_p6, %p946_p13 }
  0x4e   : > { %p944_p1 = pneg %p943_p2 }
  0x4f   : > { %p950_p5 = por %p949_p3, %p948_p10 }
  0x51   : > { %p951_p9 = pnand %p950_p5, %p944_p1 }
  0x53   : > { %954 = shalt.err (!%p951_p9)
}
  0x54   : > { %s955_s26 = scalar_lea.vmem %s1211_s6, 128  ;;  %s1048_s28 = smov [#allocation2]  }
  0x55   : > { %p956_p12 = scmp.ne.s32.totalorder %s1211_s6, %s955_s26  ;;  %s960_s27 = sshll.u32 %s1048_s28, 4  ;;  %s961_s27 = int_to_ptr.vmem [resolvable:$false] %s960_s27 }
  0x56   : > { %s962_s29 = scalar_lea.vmem %s961_s27, 256  ;;  %p963_p4 = scmp.lt.s32.totalorder %s1211_s6, %s961_s27 }
  0x57   : > { %p958_p2 = pnand %p956_p12, %p942_p0  ;;  %p964_p13 = scmp.lt.s32.totalorder %s962_s29, %s955_s26 }
  0x59   : > { %p959_p7 = pneg %p958_p2  ;;  %p965_p6 = por %p964_p13, %p963_p4 }
  0x5b   : > { %p966_p10 = pnand %p965_p6, %p959_p7 }
  0x5d   : > { %969 = shalt.err (!%p966_p10)
}
  0x5e   : > { %788 = dma.hbm_to_vmem [thread:$0]  (!%p1213_p11), %s1209_s30, 128, %s1211_s6, %s184_s7  }
  0x5f   : > { %203 = sbr.rel (%p1116_p8) target bundleno = 922 (0x39a), region = 36  ;;  %s1245_s5 = sand.u32 (!%p1116_p8), 1, %s1032_s16  }
  0x60   : > { %s703_s8 = sshll.u32 (!%p1116_p8), %s1245_s5, 3  ;;  %s206_s9 = scalar_lea.sflag (!%p1116_p8), [#allocation3], %s1245_s5 }
  0x61   : > { %s1251_s10 = scalar_lea.vmem (!%p1116_p8), [#allocation2], %s703_s8  ;;  %p1335_p4 = scmp.ne.s32.totalorder (!%p1116_p8), %s1328_s21, 0 }
  0x66   : > { %1015 = dma.done.wait (%p1335_p4), %s206_s9, 128  }
  0x67   : > { %1017 = vsyncadd (%p1335_p4), %s206_s9, 4294967168  ;;  %p1336_p7 = scmp.eq.s32.totalorder %s1097_s19, 0 }
  0x69   : > { %1019 = dma.done.wait (%p1336_p7), [#allocation6], 4096   ;;  %p1337_p8 = pmov %p1336_p7 }
  0x6a   : > { %v1049_v0 = vmov 0   ;;  %v838_v1 = vld [vmem:[#allocation5 + $0x4] ss:$8 sps:$4 sm:$0xff]   ;;  %v840_v2 = vld [vmem:[#allocation5] ss:$8 sps:$4 sm:$0xff]   ;;  %v1262_v17 = vld [vmem:[%s1251_s10] sm:$0xff] }
  0x6b   : > { %1021 = vsyncadd (%p1337_p8), [#allocation6], 4294963200  ;;  %373 = vmatprep.mubr.bf16.mxu0 %v1049_v0  ;;  %341 = vmatprep.subr.bf16.mxu0 %v838_v1  ;;  %v841_v3 = vld [vmem:[#allocation5 + $0x14] ss:$8 sps:$4 sm:$0xff]   ;;  %v843_v4 = vld [vmem:[#allocation5 + $0x10] ss:$8 sps:$4 sm:$0xff]   ;;  %v244_v18 = vpack.c.bf16 %v1262_v17, %v1262_v17 }
  0x6c   : > { %342 = vmatpush1.bf16.msra.mxu0 %v840_v2  ;;  %v844_v5 = vld [vmem:[#allocation5 + $0x24] ss:$8 sps:$4 sm:$0xff]   ;;  %v846_v6 = vld [vmem:[#allocation5 + $0x20] ss:$8 sps:$4 sm:$0xff]   ;;  %v847_v7 = vld [vmem:[#allocation5 + $0x34] ss:$8 sps:$4 sm:$0xff]  }
  0x6d   : > { %343 = vmatprep.subr.bf16.mxu0 %v841_v3  ;;  %v849_v8 = vld [vmem:[#allocation5 + $0x30] ss:$8 sps:$4 sm:$0xff]   ;;  %v850_v9 = vld [vmem:[#allocation5 + $0x44] ss:$8 sps:$4 sm:$0xff]   ;;  %v852_v10 = vld [vmem:[#allocation5 + $0x40] ss:$8 sps:$4 sm:$0xff]  }
  0x6e   : > { %v853_v11 = vld [vmem:[#allocation5 + $0x54] ss:$8 sps:$4 sm:$0xff]   ;;  %v855_v12 = vld [vmem:[#allocation5 + $0x50] ss:$8 sps:$4 sm:$0xff]   ;;  %v856_v13 = vld [vmem:[#allocation5 + $0x64] ss:$8 sps:$4 sm:$0xff]  }
  0x6f   : > { %v858_v14 = vld [vmem:[#allocation5 + $0x60] ss:$8 sps:$4 sm:$0xff]   ;;  %v859_v15 = vld [vmem:[#allocation5 + $0x74] ss:$8 sps:$4 sm:$0xff]   ;;  %v861_v16 = vld [vmem:[#allocation5 + $0x70] ss:$8 sps:$4 sm:$0xff]  }
  0x70   : > { %344 = vmatpush1.bf16.msra.mxu0 %v843_v4  ;;  %v862_v19 = vld [vmem:[#allocation7 + $0x40] sm:$0xff]   ;;  %v864_v21 = vld [vmem:[#allocation7 + $0x48] sm:$0xff]   ;;  %v866_v23 = vld [vmem:[#allocation7 + $0x50] sm:$0xff]   ;;  %s741_s30 = sshll.u32 %s1097_s19, 7  ;;  %s241_s6 = scalar_lea.vmem [#allocation8], %s703_s8 }
  0x71   : > { %345 = vmatprep.subr.bf16.mxu0 %v844_v5  ;;  %v863_v20 = vld [vmem:[#allocation7] sm:$0xff]   ;;  %744 = vmatprep.subr.bf16.mxu1 %v862_v19  ;;  %v865_v22 = vld [vmem:[#allocation7 + $0x8] sm:$0xff]   ;;  %v867_v24 = vld [vmem:[#allocation7 + $0x10] sm:$0xff]   ;;  %s606_s25 = sshll.u32 %s241_s6, 4  ;;  %s1276_s13 = scalar_lea.hbm %s1324_s4, %s741_s30  ;;  %s1278_s25 = int_to_ptr.vmem [resolvable:$true] %s606_s25 }
  0x72   : > { %745 = vmatpush3.bf16.msra.mxu1 %v863_v20  ;;  %v868_v25 = vld [vmem:[#allocation7 + $0x58] sm:$0xff]   ;;  %v870_v27 = vld [vmem:[#allocation7 + $0x60] sm:$0xff]   ;;  %v872_v29 = vld [vmem:[#allocation7 + $0x68] sm:$0xff]   ;;  %s593_s24 = scalar_lea.sflag [#allocation4], %s1245_s5  ;;  %s970_s26 = scalar_lea.vmem %s1278_s25, 128 }
  0x73   : > { %746 = vmatprep.subr.bf16.mxu1 %v864_v21  ;;  %v869_v26 = vld [vmem:[#allocation7 + $0x18] sm:$0xff]   ;;  %v871_v28 = vld [vmem:[#allocation7 + $0x20] sm:$0xff]   ;;  %v873_v30 = vld [vmem:[#allocation7 + $0x28] sm:$0xff]   ;;  %p971_p11 = scmp.ne.s32.totalorder %s1278_s25, %s970_s26  ;;  %p1338_p0 = scmp.ne.s32.totalorder %s1333_s20, 0 }
  0x74   : > { %346 = vmatpush1.bf16.msra.mxu0 %v846_v6  ;;  %v874_v31 = vld [vmem:[#allocation7 + $0x70] sm:$0xff]   ;;  %v876_v33 = vld [vmem:[#allocation7 + $0x78] sm:$0xff]   ;;  %s1050_s19 = smov [#allocation8]  }
  0x75   : > { %347 = vmatprep.subr.bf16.mxu0 %v847_v7  ;;  %v875_v32 = vld [vmem:[#allocation7 + $0x30] sm:$0xff]   ;;  %v877_v34 = vld [vmem:[#allocation7 + $0x38] sm:$0xff]   ;;  %p972_p1 = pnand %p971_p11, %p1338_p0  ;;  %s974_s28 = sshll.u32 %s1050_s19, 4  ;;  %s975_s28 = int_to_ptr.vmem [resolvable:$false] %s974_s28 }
  0x76   : > { %747 = vmatpush3.bf16.msra.mxu1 %v865_v22  ;;  %s976_s27 = scalar_lea.vmem %s975_s28, 256  ;;  %p977_p5 = scmp.lt.s32.totalorder %s1278_s25, %s975_s28 }
  0x77   : > { %748 = vmatprep.subr.bf16.mxu1 %v866_v23  ;;  %p973_p3 = pneg %p972_p1  ;;  %p978_p9 = scmp.lt.s32.totalorder %s976_s27, %s970_s26 }
  0x78   : > { %348 = vmatpush1.bf16.msra.mxu0 %v849_v8  ;;  %v739_v8 = vld [vmem:[%s1323_s3] ss:$0 sm:$0xff] }
  0x79   : > { %349 = vmatprep.subr.bf16.mxu0 %v850_v9  ;;  %p979_p12 = por %p978_p9, %p977_p5 }
  0x7a   : > { %749 = vmatpush3.bf16.msra.mxu1 %v867_v24 }
  0x7b   : > { %750 = vmatprep.subr.bf16.mxu1 %v868_v25  ;;  %p980_p2 = pnand %p979_p12, %p973_p3 }
  0x7c   : > { %350 = vmatpush1.bf16.msra.mxu0 %v852_v10 }
  0x7d   : > { %351 = vmatprep.subr.bf16.mxu0 %v853_v11 }
  0x7e   : > { %751 = vmatpush3.bf16.msra.mxu1 %v869_v26 }
  0x7f   : > { %752 = vmatprep.subr.bf16.mxu1 %v870_v27 }
  0x80   : > { %352 = vmatpush1.bf16.msra.mxu0 %v855_v12 }
  0x81   : > { %353 = vmatprep.subr.bf16.mxu0 %v856_v13 }
  0x82   : > { %753 = vmatpush3.bf16.msra.mxu1 %v871_v28 }
  0x83   : > { %754 = vmatprep.subr.bf16.mxu1 %v872_v29 }
  0x84   : > { %354 = vmatpush1.bf16.msra.mxu0 %v858_v14 }
  0x85   : > { %355 = vmatprep.subr.bf16.mxu0 %v859_v15 }
  0x86   : > { %755 = vmatpush3.bf16.msra.mxu1 %v873_v30 }
  0x87   : > { %756 = vmatprep.subr.bf16.mxu1 %v874_v31 }
  0x88   : > { %356 = vmatpush1.bf16.msra.mxu0 %v861_v16 }
  0x8a   : > { %757 = vmatpush3.bf16.msra.mxu1 %v875_v32 }
  0x8b   : > { %374 = vmatmul.mubr.bf16.vlgmr.msra.gmra.mrb[0].mxu0 %v244_v18  ;;  %758 = vmatprep.subr.bf16.mxu1 %v876_v33 }
  0x8e   : > { %759 = vmatpush3.bf16.msra.mxu1 %v877_v34 }
 0x15e   : > { %v375_v35 = vpop.f32.mrb[0].mxu0 }
 0x15f   : > { %v382_v36 = vmul.f32 %v375_v35, %v375_v35  ;;  %v377_v37 = vpop.f32.mrb[1].mxu0 }
 0x160   : > { %v383_v38 = vmul.f32 %v377_v37, %v377_v37  ;;  %v379_v39 = vpop.f32.mrb[2].mxu0 }
 0x161   : > { %v384_v40 = vmul.f32 %v382_v36, %v375_v35  ;;  %v380_v41 = vpop.f32.mrb[3].mxu0 }
 0x162   : > { %v385_v42 = vmul.f32 %v383_v38, %v377_v37 }
 0x163   : > { %v386_v43 = vmul.f32 0.044715, %v384_v40 }
 0x164   : > { %v387_v44 = vmul.f32 0.044715, %v385_v42 }
 0x165   : > { %v388_v45 = vadd.f32 %v386_v43, %v375_v35 }
 0x166   : > { %v389_v46 = vadd.f32 %v387_v44, %v377_v37 }
 0x167   : > { %v390_v47 = vmul.f32 0.7978846, %v388_v45 }
 0x168   : > { %v391_v48 = vmul.f32 0.7978846, %v389_v46 }
 0x169   : > { %878 = vtanh.f32 %v390_v47 }
 0x16a   : > { %880 = vtanh.f32 %v391_v48 }
 0x173   : > { %v879_v49 = vpop.eup %878 }
 0x174   : > { %v881_v50 = vpop.eup %880  ;;  %v394_v51 = vadd.f32 1.0, %v879_v49 }
 0x175   : > { %v395_v52 = vadd.f32 1.0, %v881_v50 }
 0x176   : > { %v396_v53 = vmul.f32 0.5, %v394_v51 }
 0x177   : > { %v397_v54 = vmul.f32 0.5, %v395_v52 }
 0x178   : > { %v398_v55 = vmul.f32 %v396_v53, %v375_v35 }
 0x179   : > { %v399_v56 = vmul.f32 %v397_v54, %v377_v37 }
 0x17a   : > { %v400_v58 = vpack.c.bf16 %v398_v55, %v398_v55 }
 0x17b   : > { %v401_v57 = vpack.c.bf16 %v399_v56, %v399_v56 }
 0x17d   : > { %562 = vmatprep.mubr.bf16.mxu1 %v401_v57 }
 0x17e   : > { %563 = vmatmul.mubr.bf16.vlgmr.msra.gmra.mrb[0].mxu1 %v400_v58 }
 0x251   : > { %v760_v59 = vpop.f32.mrb[0].mxu1 }
 0x252   : > { %v761_v60 = vpop.f32.mrb[1].mxu1 }
 0x253   : > { %v762_v61 = vadd.f32 %v761_v60, %v760_v59  ;;  %v763_v62 = vpop.f32.mrb[2].mxu1 }
 0x254   : > { %v764_v63 = vpop.f32.mrb[3].mxu1 }
 0x255   : > { %570 = vadd.xlane.f32.xlu0 %v762_v61 }
 0x2e2   : > { %v571_v0 = vpop.xlane.xlu0 %570 }
 0x2e3   : > { %v573_v1 = vmul.f32 0.0078125, %v571_v0 }
 0x2e5   : > { %v574_v2 = vsub.f32 %v762_v61, %v573_v1 }
 0x2e7   : > { %v575_v3 = vmul.f32 %v574_v2, %v574_v2 }
 0x2e9   : > { %576 = vadd.xlane.f32.xlu0 %v575_v3 }
 0x376   : > { %v577_v4 = vpop.xlane.xlu0 %576 }
 0x377   : > { %v578_v5 = vmul.f32 0.0078125, %v577_v4 }
 0x379   : > { %v579_v6 = vadd.f32 1e-05, %v578_v5 }
 0x37b   : > { %882 = vrsqrt.f32 %v579_v6 }
 0x385   : > { %v883_v7 = vpop.eup %882 }
 0x386   : > { %v581_v9 = vmul.f32 %v883_v7, %v574_v2 }
 0x388   : > { %v589_v10 = vmul.f32 %v739_v8, %v581_v9 }
 0x38a   : > { %v590_v11 = vadd.f32 %v589_v10, %v1262_v17 }
 0x38c   : > { %591 = vst [vmem:[%s241_s6] sm:$0xff] %v590_v11 }
 0x38d   : > { %983 = shalt.err (!%p980_p2)
}
 0x38e   : > { %s984_s29 = scalar_lea.hbm %s1276_s13, 128  ;;  %s988_s9 = scalar_lea.hbm %s1324_s4, 256 }
 0x38f   : > { %p985_p13 = scmp.ne.s32.totalorder %s1276_s13, %s984_s29  ;;  %p989_p4 = scmp.lt.u32.totalorder %s1276_s13, %s1324_s4 }
 0x390   : > { %p990_p7 = scmp.lt.u32.totalorder %s988_s9, %s984_s29  ;;  %p992_p11 = scmp.lt.u32.totalorder %s984_s29, %s1276_s13 }
 0x391   : > { %p986_p6 = pnand %p985_p13, %p1338_p0 }
 0x392   : > { %p991_p8 = por %p990_p7, %p989_p4 }
 0x393   : > { %p987_p10 = pneg %p986_p6 }
 0x394   : > { %p993_p1 = por %p992_p11, %p991_p8 }
 0x396   : > { %p994_p3 = pnand %p993_p1, %p987_p10 }
 0x398   : > { %997 = shalt.err (!%p994_p3)
}
 0x399   : > { %776 = dma.vmem_to_hbm [thread:$0]  (%p1338_p0), %s1278_s25, 128, %s1276_s13, %s593_s24  }
 0x39a PF: > { %s618_s23 = sand.u32 1, %s1028_s15   ;;  %p1339_p5 = scmp.ne.s32.totalorder %s1329_s22, 0 }
 0x39b   : > { %p1340_p9 = scmp.ge.s32.totalorder %s1040_s18, 2  ;;  %s619_s30 = scalar_lea.sflag [#allocation4], %s618_s23 }
 0x39d   : > { %p790_p12 = pnand %p1340_p9, %p1339_p5 }
 0x39f   : > { %1023 = dma.done.wait (!%p790_p12), %s619_s30, 128  }
 0x3a0   : > { %1025 = vsyncadd (!%p790_p12), %s619_s30, 4294967168  ;;  %p18_p2 = scmp.ge.s32.totalorder %s1186_s11, 4   ;;  %s1341_s15 = smov %s1032_s16 }
 0x3a1   : > { %s1342_s16 = smov %s1036_s17  ;;  %s1343_s17 = smov %s1195_s14 }
 0x3a2   : > { %s1344_s18 = smov %s1186_s11  ;;  %20 = sbr.rel (!%p18_p2) target bundleno = 6 (0x6), region = 89 }
 0x3a9   :  { %624 = vsyncpa [#allocation3], 1 }
 0x3aa   :  { %626 = vsyncpa [#allocation3 + $0x1], 1 }
 0x3ab   :  { %627 = vsyncpa [#allocation6], 1 }
 0x3ac   :  { %628 = vsyncpa [#allocation4], 1 }
 0x3ad   :  { %630 = vsyncpa [#allocation4 + $0x1], 1 }

</bundles_post_ra>
